<compile_context>
chip_gen: v6e
topology: v6e:2x2x1
jax: 0.10.0
libtpu: 0.0.40
codegen_flags: <defaults>
</compile_context>

<pallas_src>
import functools

import jax
import jax.numpy as jnp
from jax.experimental import pallas as pl
from jax.experimental.pallas import tpu as pltpu


def _round_up(x, m):
    return (x + m - 1) // m * m


def _vmem_capacity_bytes(default=64 * 2**20):
    """Physical VMEM per core; falls back to the smallest current part (v7x)."""
    try:
        info = pltpu.get_tpu_info()
        cap = getattr(info, "vmem_capacity_bytes", None)
        if cap:
            return int(cap)
    except Exception:
        pass
    return default


def _vmem_limit_bytes():
    """Generation-aware scoped-VMEM limit with compiler headroom."""
    cap = _vmem_capacity_bytes()
    return max(32 * 2**20, min(cap - 16 * 2**20, int(cap * 0.8)))


def _single_buffer_supported():
    """True if BlockSpec(pipeline_mode=pl.Buffered(1)) is available."""
    buffered = getattr(pl, "Buffered", None)
    if buffered is None:
        return False
    try:
        pl.BlockSpec((8, 128), lambda i: (0, 0), pipeline_mode=buffered(1))
        return True
    except Exception:
        return False


def _spmm_tiled_kernel(adj_ref, emb_ref, out_ref, acc_ref):
    # grid = (row blocks, K blocks); K (reduction) is the innermost "arbitrary" axis.
    k = pl.program_id(1)

    @pl.when(k == 0)
    def _init():
        acc_ref[...] = jnp.zeros_like(acc_ref)

    acc_ref[...] += jnp.dot(
        adj_ref[...], emb_ref[...], preferred_element_type=jnp.float32
    )

    @pl.when(k == pl.num_programs(1) - 1)
    def _finalize():
        out_ref[...] = acc_ref[...].astype(out_ref.dtype)


def _spmm_resident_kernel(tk, adj_ref, emb_ref, out_ref, acc_ref):
    # emb_ref holds the whole (Kp, D) table, VMEM-resident (constant block index,
    # single-buffered) -> fetched from HBM exactly once.
    k = pl.program_id(1)

    @pl.when(k == 0)
    def _init():
        acc_ref[...] = jnp.zeros_like(acc_ref)

    k_off = pl.multiple_of(k * tk, 128)
    acc_ref[...] += jnp.dot(
        adj_ref[...],
        emb_ref[pl.ds(k_off, tk), :],
        preferred_element_type=jnp.float32,
    )

    @pl.when(k == pl.num_programs(1) - 1)
    def _finalize():
        out_ref[...] = acc_ref[...].astype(out_ref.dtype)


def _plan_tiles(N, K, D, c_size, o_size, tm_max, tk_max, embeds_resident, emb_bufs):
    vmem_limit = _vmem_limit_bytes()
    budget = int(vmem_limit * 0.85)  # headroom for compiler-internal scratch

    tm_full = _round_up(N, 8)
    tm = min(_round_up(tm_max, 8), tm_full)
    if tm >= tm_full and N > 8:
        # >= 2 steps on the "parallel" axis so both v7x TensorCores get work.
        tm = _round_up(-(-N // 2), 8)
    tk = min(_round_up(tk_max, 128), _round_up(K, 128))

    def footprint(tm_, tk_, emb_bytes):
        adj = 2 * tm_ * tk_ * c_size           # double-buffered adj tile
        out = 2 * tm_ * D * o_size             # double-buffered output tile
        acc = tm_ * D * 4                      # f32 accumulator scratch
        return adj + out + acc + emb_bytes

    # Shrink tiles until at least the non-resident footprint fits the budget.
    while footprint(tm, tk, 2 * tk * D * c_size) > budget and tk > 128:
        tk = max(128, _round_up(tk // 2, 128))
    while footprint(tm, tk, 2 * tk * D * c_size) > budget and tm > 8:
        tm = max(8, _round_up(tm // 2, 8))

    Np = _round_up(N, tm)
    Kp = _round_up(K, tk)

    if embeds_resident is None:
        resident = footprint(tm, tk, emb_bufs * Kp * D * c_size) <= budget
    else:
        resident = bool(embeds_resident)
    return tm, tk, Np, Kp, resident, vmem_limit


def make_gcn_layer(
    adj,
    feature_dim,
    *,
    compute_dtype=None,
    out_dtype=None,
    tm_max=1024,
    tk_max=2048,
    embeds_resident=None,
):
    """Prepare the adjacency once; returns `apply(embeds) -> adj @ embeds`.

    compute_dtype defaults to the adjacency dtype (no silent downcast); pass
    jnp.bfloat16 to halve the dominant adjacency HBM stream.
    """
    N, K = adj.shape
    D = int(feature_dim)
    compute_dtype = jnp.dtype(adj.dtype if compute_dtype is None else compute_dtype)
    out_dtype = jnp.dtype(compute_dtype if out_dtype is None else out_dtype)

    single_buf = _single_buffer_supported()
    tm, tk, Np, Kp, resident, vmem_limit = _plan_tiles(
        N, K, D, compute_dtype.itemsize, out_dtype.itemsize,
        tm_max, tk_max, embeds_resident, emb_bufs=1 if single_buf else 2,
    )

    # Prepare the adjacency ONCE (cast + zero-pad are mathematically neutral);
    # cached in the returned closure so repeated layers / steps pay nothing.
    adj_c = adj if adj.dtype == compute_dtype else adj.astype(compute_dtype)
    if (Np, Kp) != (N, K):
        adj_c = jnp.pad(adj_c, ((0, Np - N), (0, Kp - K)))

    if resident:
        kernel = functools.partial(_spmm_resident_kernel, tk)
        emb_kwargs = {"pipeline_mode": pl.Buffered(1)} if single_buf else {}
        emb_spec = pl.BlockSpec((Kp, D), lambda i, k: (0, 0), **emb_kwargs)
    else:
        kernel = _spmm_tiled_kernel
        emb_spec = pl.BlockSpec((tk, D), lambda i, k: (k, 0))

    spmm = pl.pallas_call(
        kernel,
        out_shape=jax.ShapeDtypeStruct((Np, D), out_dtype),
        grid_spec=pltpu.PrefetchScalarGridSpec(
            num_scalar_prefetch=0,
            grid=(Np // tm, Kp // tk),
            in_specs=[pl.BlockSpec((tm, tk), lambda i, k: (i, k)), emb_spec],
            out_specs=pl.BlockSpec((tm, D), lambda i, k: (i, 0)),
            scratch_shapes=[pltpu.VMEM((tm, D), jnp.float32)],
        ),
        compiler_params=pltpu.CompilerParams(
            dimension_semantics=("parallel", "arbitrary"),
            vmem_limit_bytes=int(vmem_limit),
        ),
    )

    def apply(embeds):
        K2, D2 = embeds.shape
        assert K2 == K and D2 == D, "embeds must be (K, feature_dim)"
        emb_c = embeds if embeds.dtype == compute_dtype else embeds.astype(compute_dtype)
        if Kp != K:
            emb_c = jnp.pad(emb_c, ((0, Kp - K), (0, 0)))
        out = spmm(adj_c, emb_c)
        return out[:N] if Np != N else out

    return apply


def gcn_layer(adj, embeds, **kwargs):
    """One-shot `adj @ embeds` (dense equivalent of torch.spmm)."""
    kwargs.setdefault("out_dtype", embeds.dtype)
    return make_gcn_layer(adj, embeds.shape[-1], **kwargs)(embeds)


if __name__ == "__main__":
    key = jax.random.PRNGKey(0)
    k_adj, k_emb = jax.random.split(key)

    # ---- Test 1: demo graph (256 nodes, 128-dim embeddings), f32 compute
    # (torch.spmm numerics), resident embeds, reused prepared adjacency. ----
    N, D = 256, 128
    raw = jax.random.uniform(k_adj, (N, N), dtype=jnp.float32)
    adj = jnp.where(raw > 0.9, raw, 0.0)  # ~10% nonzeros
    embeds = jax.random.normal(k_emb, (N, D), dtype=jnp.float32)

    layer = make_gcn_layer(adj, D)        # adjacency cast/pad happens exactly once
    out = layer(embeds)
    jax.block_until_ready(out)
    assert out.shape == (N, D)
    ref = jnp.dot(adj, embeds, precision=jax.lax.Precision.HIGHEST)
    assert jnp.allclose(out, ref, atol=5e-2, rtol=1e-2), "mismatch vs f32 reference"

    out_b = layer(2.0 * embeds)           # reuse of the prepared adjacency
    jax.block_until_ready(out_b)
    assert jnp.allclose(out_b, 2.0 * ref, atol=1e-1, rtol=1e-2), "mismatch on reuse"

    # ---- Test 2: non-aligned shape, opt-in bf16 compute, forced non-resident
    # multi-step tiled K reduction (exercises padding + accumulation). ----
    N2, K2, D2 = 300, 300, 128
    raw2 = jax.random.uniform(jax.random.PRNGKey(1), (N2, K2), dtype=jnp.float32)
    adj2 = jnp.where(raw2 > 0.9, raw2, 0.0)
    emb2 = jax.random.normal(jax.random.PRNGKey(2), (K2, D2), dtype=jnp.float32)

    out2 = gcn_layer(
        adj2, emb2,
        compute_dtype=jnp.bfloat16,
        tm_max=128, tk_max=128,
        embeds_resident=False,
    )
    jax.block_until_ready(out2)
    assert out2.shape == (N2, D2)
    ref2_bf16 = jnp.dot(adj2.astype(jnp.bfloat16), emb2.astype(jnp.bfloat16),
                        preferred_element_type=jnp.float32)
    ref2_f32 = jnp.dot(adj2, emb2, precision=jax.lax.Precision.HIGHEST)
    assert jnp.allclose(out2, ref2_bf16, atol=2e-2, rtol=2e-2), "mismatch vs bf16 ref"
    assert jnp.allclose(out2, ref2_f32, atol=5e-1, rtol=5e-2), "mismatch vs f32 ref"

    # ---- Test 3: resident embeds with a multi-step K reduction (dynamic-slice
    # path in the resident kernel). ----
    N3, K3, D3 = 256, 512, 128
    adj3 = jnp.where(
        jax.random.uniform(jax.random.PRNGKey(3), (N3, K3), dtype=jnp.float32) > 0.9,
        1.0, 0.0)
    emb3 = jax.random.normal(jax.random.PRNGKey(4), (K3, D3), dtype=jnp.float32)
    out3 = gcn_layer(adj3, emb3, tk_max=128, embeds_resident=True)
    jax.block_until_ready(out3)
    ref3 = jnp.dot(adj3, emb3, precision=jax.lax.Precision.HIGHEST)
    assert jnp.allclose(out3, ref3, atol=5e-2, rtol=1e-2), "mismatch (resident, multi-K)"

    print("KERNEL_OK")
</pallas_src>

<mosaic_0001>
module attributes {stable_mosaic.version = 11 : i64} {
  func.func @_spmm_resident_kernel(%arg0: i32, %arg1: i32, %arg2: memref<128x256xf32, #tpu.memory_space<vmem>>, %arg3: memref<256x128xf32, #tpu.memory_space<vmem>>, %arg4: memref<128x128xf32, #tpu.memory_space<vmem>>, %arg5: memref<128x128xf32, #tpu.memory_space<vmem>>) attributes {dimension_semantics = [#tpu.dimension_semantics<parallel>, #tpu.dimension_semantics<arbitrary>], iteration_bounds = array<i64: 2, 1>, scalar_prefetch = 0 : i64, scratch_operands = 1 : i64, tpu.core_type = #tpu.core_type<tc>, window_params = [{transform_indices = @transform_0, window_bounds = array<i64: 128, 256>}, {pipeline_mode = #tpu.pipeline_mode<synchronous>, transform_indices = @transform_1, window_bounds = array<i64: 256, 128>}, {transform_indices = @transform_2, window_bounds = array<i64: 128, 128>}]} {
    %c0_i32 = arith.constant 0 : i32
    %0 = arith.cmpi eq, %arg1, %c0_i32 : i32
    %1 = arith.extui %0 : i1 to i32
    %c0_i32_0 = arith.constant 0 : i32
    %2 = arith.cmpi ne, %1, %c0_i32_0 : i32
    scf.if %2 {
      %cst_9 = arith.constant 0.000000e+00 : f32
      %15 = vector.broadcast %cst_9 : f32 to vector<128x128xf32>
      %c0_10 = arith.constant 0 : index
      %c0_11 = arith.constant 0 : index
      %16 = vector.load %arg5[%c0_10, %c0_11] : memref<128x128xf32, #tpu.memory_space<vmem>>, vector<128x128xf32>
      tpu.vector_store %arg5[%c0_10, %c0_11], %15 {strides = array<i32>} : memref<128x128xf32, #tpu.memory_space<vmem>>, vector<128x128xf32>,
    } else {
    }
    %c256_i32 = arith.constant 256 : i32
    %3 = arith.muli %arg1, %c256_i32 : i32
    %4 = tpu.assume_multiple %3, 128 : i32
    %c0 = arith.constant 0 : index
    %c0_1 = arith.constant 0 : index
    %5 = vector.load %arg5[%c0, %c0_1] : memref<128x128xf32, #tpu.memory_space<vmem>>, vector<128x128xf32>
    %c0_2 = arith.constant 0 : index
    %c0_3 = arith.constant 0 : index
    %6 = vector.load %arg2[%c0_2, %c0_3] : memref<128x256xf32, #tpu.memory_space<vmem>>, vector<128x256xf32>
    %7 = arith.index_cast %4 : i32 to index
    %c0_4 = arith.constant 0 : index
    %8 = vector.load %arg3[%7, %c0_4] : memref<256x128xf32, #tpu.memory_space<vmem>>, vector<256x128xf32>
    %cst = arith.constant dense<0.000000e+00> : vector<128x128xf32>
    %9 = tpu.matmul %6, %8, %cst {dimension_numbers = #tpu.dot_dimension_numbers<[1], [0], [0], [1], [0, 0, 1, 1], [], []>} : vector<128x256xf32>, vector<256x128xf32>, vector<128x128xf32> -> vector<128x128xf32>
    %10 = arith.addf %5, %9 : vector<128x128xf32>
    %c0_5 = arith.constant 0 : index
    %c0_6 = arith.constant 0 : index
    %11 = vector.load %arg5[%c0_5, %c0_6] : memref<128x128xf32, #tpu.memory_space<vmem>>, vector<128x128xf32>
    tpu.vector_store %arg5[%c0_5, %c0_6], %10 {strides = array<i32>} : memref<128x128xf32, #tpu.memory_space<vmem>>, vector<128x128xf32>,
    %c0_i32_7 = arith.constant 0 : i32
    %12 = arith.cmpi eq, %arg1, %c0_i32_7 : i32
    %13 = arith.extui %12 : i1 to i32
    %c0_i32_8 = arith.constant 0 : i32
    %14 = arith.cmpi ne, %13, %c0_i32_8 : i32
    scf.if %14 {
      %c0_9 = arith.constant 0 : index
      %c0_10 = arith.constant 0 : index
      %15 = vector.load %arg5[%c0_9, %c0_10] : memref<128x128xf32, #tpu.memory_space<vmem>>, vector<128x128xf32>
      %c0_11 = arith.constant 0 : index
      %c0_12 = arith.constant 0 : index
      %16 = vector.load %arg4[%c0_11, %c0_12] : memref<128x128xf32, #tpu.memory_space<vmem>>, vector<128x128xf32>
      tpu.vector_store %arg4[%c0_11, %c0_12], %15 {strides = array<i32>} : memref<128x128xf32, #tpu.memory_space<vmem>>, vector<128x128xf32>,
    } else {
    }
    return
  }
  func.func @transform_0(%arg0: i32, %arg1: i32) -> (i32, i32) {
    %c0_i32 = arith.constant 0 : i32
    return %arg0, %arg1 : i32, i32
  }
  func.func @transform_1(%arg0: i32, %arg1: i32) -> (i32, i32) {
    %c0_i32 = arith.constant 0 : i32
    %c0_i32_0 = arith.constant 0 : i32
    %c0_i32_1 = arith.constant 0 : i32
    return %c0_i32, %c0_i32_0 : i32, i32
  }
  func.func @transform_2(%arg0: i32, %arg1: i32) -> (i32, i32) {
    %c0_i32 = arith.constant 0 : i32
    %c0_i32_0 = arith.constant 0 : i32
    return %arg0, %c0_i32 : i32, i32
  }
}

</mosaic_0001>

<bundles_post_ra>
// kernel: tpu_custom_call.1
= control target key start
LH: loop header
LB: loop body
LE: loop exit
PB: predicated region body
PF: predicated region fallthrough
CT: control target
= control target key end

     0   :  { %7 = vsyncpa [#allocation4], 0  ;;  %s1232_s0 = inlined_call_operand.hbm [shape: f32[256,256], index: 0, kind: input, shape index: {}]   ;;  %s1233_s1 = inlined_call_operand.hbm [shape: f32[256,128], index: 1, kind: input, shape index: {}]   ;;  %s1234_s2 = inlined_call_operand.hbm [shape: f32[256,128], index: 2, kind: output, shape index: {}]  }
   0x1   :  { %9 = vsyncpa [#allocation4 + $0x1], 0 }
   0x2   :  { %10 = vsyncpa [#allocation7], 0 }
   0x3   :  { %11 = vsyncpa [#allocation5], 0 }
   0x4   :  { %13 = vsyncpa [#allocation5 + $0x1], 0  ;;  %s997_s9 = smov 0   ;;  %s999_s10 = smov 0  }
   0x5   :  { %s1001_s11 = smov 0   ;;  %s1003_s12 = smov 0  }
   0x6   :  { %s1005_s13 = smov 0   ;;  %s1007_s14 = smov 0  }
   0x7 LB: > { %s621_s15 = sadd.s32 4294967295, %s971_s14   ;;  %s622_s16 = sadd.s32 4294967294, %s971_s14   ;;  %s971_s14 = sphi %s1007_s14, %s19_s14   ;;  %s967_s13 = sphi %s1005_s13, %s1252_s13   ;;  %s963_s12 = sphi %s1003_s12, %s1251_s12   ;;  %s959_s11 = sphi %s1001_s11, %s1250_s11   ;;  %s955_s10 = sphi %s999_s10, %s1249_s10   ;;  %s951_s9 = sphi %s997_s9, %s1248_s9  }
   0x8   : > { %p53_p0 = scmp.ne.s32.totalorder %s955_s10, %s951_s9  ;;  %p1031_p1 = scmp.eq.s32.totalorder %s621_s15, 0 }
   0x9   : > { %p1035_p2 = scmp.eq.s32.totalorder %s621_s15, 1  ;;  %p104_p3 = scmp.eq.s32.totalorder %s622_s16, 1 }
   0xa   : > { %p1041_p4 = por %p1031_p1, %p53_p0  ;;  %p623_p5 = scmp.ge.s32.totalorder %s971_s14, 1 }
   0xb   : > { %p1046_p6 = por %p104_p3, %p53_p0  ;;  %p111_p7 = scmp.lt.s32.totalorder %s971_s14, 3 }
   0xc   : > { %s1238_s19 = scalar_select %p1041_p4, 1, 0 }
   0xd   : > { %s1239_s20 = scalar_select %p1046_p6, 1, 0 }
   0xe   : > { %p1051_p8 = pnand %p623_p5, %p111_p7  ;;  %s973_s22 = smov [#allocation6]  }
   0xf   : > { %s123_s23 = sshll.u32 %s973_s22, 4  ;;  %s31_s25 = sadd.s32 1, %s967_s13  ;;  %s124_s23 = int_to_ptr.vmem [resolvable:$true] %s123_s23 }
  0x10   : > { %p762_p9 = pneg %p1051_p8  ;;  %s844_s26 = scalar_lea.vmem %s124_s23, 4096 }
  0x11   : > { %p845_p13 = scmp.ne.s32.totalorder %s124_s23, %s844_s26  ;;  %p852_p5 = scmp.lt.s32.totalorder %s124_s23, %s124_s23 }
  0x12   : > { %p1060_p11 = pnand %p762_p9, %p1031_p1  ;;  %p853_p7 = scmp.lt.s32.totalorder %s844_s26, %s844_s26 }
  0x14   : > { %p835_p12 = pneg %p1060_p11  ;;  %p854_p6 = por %p853_p7, %p852_p5 }
  0x16   : > { %p847_p0 = pnand %p845_p13, %p835_p12 }
  0x18   : > { %p848_p3 = pneg %p847_p0 }
  0x1a   : > { %p855_p4 = pnand %p854_p6, %p848_p3 }
  0x1c   : > { %858 = shalt.err (!%p855_p4)
}
  0x1d   : > { %s974_s27 = smov 128   ;;  %s975_s28 = smov 8  }
  0x1e   : > { %765 = dma.hbm_to_vmem [thread:$0]  (!%p1060_p11), %s1233_s1, 4096, %s124_s23, [#allocation7], %s974_s27, %s974_s27, %s975_s28  }
  0x1f   : > { %p33_p6 = scmp.ge.s32.totalorder %s31_s25, 2  ;;  %s40_s3 = sadd.s32 1, %s959_s11 }
  0x20   : > { %p47_p4 = scmp.ne.s32.totalorder %s959_s11, %s955_s10  ;;  %p48_p9 = scmp.eq.s32.totalorder %s971_s14, 0 }
  0x21   : > { %s1254_s25 = smov (%p33_p6, %s31_s25), 0  ;;  %p775_p0 = scmp.lt.s32.totalorder %s971_s14, 2 }
  0x22   : > { %p1078_p12 = por %p48_p9, %p47_p4  ;;  %p1084_p13 = por %p1035_p2, %p47_p4 }
  0x23   : > { %s35_s6 = ssub.s32 %s967_s13, %s1254_s25  ;;  %s137_s7 = sand.u32 1, %s959_s11  }
  0x24   : > { %p38_p11 = scmp.eq.s32.totalorder %s35_s6, 0  ;;  %s626_s8 = sshll.u32 %s137_s7, 8 }
  0x25   : > { %s640_s16 = sshll.u32 %s967_s13, 12  ;;  %s141_s26 = scalar_lea.vmem [#allocation3], %s626_s8 }
  0x26   : > { %s1093_s15 = scalar_select %p38_p11, %s959_s11, %s40_s3  }
  0x27   : > { %s150_s24 = scalar_lea.hbm %s1232_s0, %s640_s16  ;;  %s151_s27 = sshll.u32 %s141_s26, 4  ;;  %s152_s27 = int_to_ptr.vmem [resolvable:$true] %s151_s27 }
  0x28   : > { %p1101_p2 = pnand %p775_p0, %p1078_p12  ;;  %s138_s28 = scalar_lea.sflag [#allocation4], %s137_s7 }
  0x29   : > { %s872_s29 = scalar_lea.vmem %s152_s27, 4096  ;;  %s976_s30 = smov [#allocation3]  }
  0x2a   : > { %p861_p3 = pneg %p1101_p2  ;;  %p873_p5 = scmp.ne.s32.totalorder %s152_s27, %s872_s29 }
  0x2b   : > { %s877_s3 = sshll.u32 %s976_s30, 4  ;;  %s878_s3 = int_to_ptr.vmem [resolvable:$false] %s877_s3 }
  0x2c   : > { %p875_p7 = pnand %p873_p5, %p861_p3  ;;  %s879_s6 = scalar_lea.vmem %s878_s3, 8192 }
  0x2d   : > { %p880_p4 = scmp.lt.s32.totalorder %s152_s27, %s878_s3  ;;  %p881_p9 = scmp.lt.s32.totalorder %s879_s6, %s872_s29 }
  0x2e   : > { %p876_p6 = pneg %p875_p7 }
  0x2f   : > { %p882_p11 = por %p881_p9, %p880_p4 }
  0x31   : > { %p883_p10 = pnand %p882_p11, %p876_p6 }
  0x33   : > { %886 = shalt.err (!%p883_p10)
}
  0x34   : > { %s977_s4 = smov 256   ;;  %s978_s8 = smov 16  }
  0x35   : > { %769 = dma.hbm_to_vmem [thread:$0]  (!%p1101_p2), %s150_s24, 4096, %s152_s27, %s138_s28, %s977_s4, %s977_s4, %s978_s8  }
  0x36   : > { %163 = sbr.rel (%p1051_p8) target bundleno = 335 (0x14f), region = 28  ;;  %s1112_s7 = sand.u32 (!%p1051_p8), 1, %s955_s10  }
  0x37   : > { %s631_s16 = sshll.u32 (!%p1051_p8), %s1112_s7, 8  ;;  %s166_s22 = scalar_lea.sflag (!%p1051_p8), [#allocation4], %s1112_s7 }
  0x38   : > { %s1116_s23 = scalar_lea.vmem (!%p1051_p8), [#allocation3], %s631_s16  ;;  %p1245_p12 = scmp.ne.s32.totalorder (!%p1051_p8), %s1238_s19, 0 }
  0x3b   : > { %938 = dma.done.wait (%p1245_p12), %s166_s22, 4096  }
  0x3c   : > { %940 = vsyncadd (%p1245_p12), %s166_s22, 4294963200 }
  0x3d   : > { %942 = dma.done.wait (%p1031_p1), [#allocation7], 4096  }
  0x3e   : > { %944 = vsyncadd (%p1031_p1), [#allocation7], 4294963200  ;;  %v298_v0 = vld [vmem:[#allocation6 + $0xf8] sm:$0xff]  ;;  %v297_v2 = vld [vmem:[#allocation6 + $0xf0] sm:$0xff]  ;;  %s633_s17 = sshll.u32 %s1112_s7, 7  ;;  %s641_s21 = sshll.u32 %s963_s12, 11 }
  0x3f   : > { %v282_v1 = vld [vmem:[#allocation6 + $0x78] sm:$0xff]  ;;  %642 = vmatprep.subr.mxu0 %v298_v0  ;;  %722 = vmatprep.subr.mxu1 %v298_v0  ;;  %v281_v3 = vld [vmem:[#allocation6 + $0x70] sm:$0xff]  ;;  %v296_v4 = vld [vmem:[#allocation6 + $0xe8] sm:$0xff]  ;;  %s1159_s19 = scalar_lea.vmem [#allocation8], %s633_s17  ;;  %s1180_s18 = scalar_lea.hbm %s1234_s2, %s641_s21 }
  0x40   : > { %643 = vmatpush3.msra.mxu0 %v282_v1  ;;  %738 = vmatpush3.msra.mxu1 %v282_v1  ;;  %v280_v5 = vld [vmem:[#allocation6 + $0x68] sm:$0xff]  ;;  %v295_v6 = vld [vmem:[#allocation6 + $0xe0] sm:$0xff]  ;;  %v294_v8 = vld [vmem:[#allocation6 + $0xd8] sm:$0xff]  ;;  %s525_s24 = sshll.u32 %s1159_s19, 4  ;;  %s512_s12 = scalar_lea.sflag [#allocation5], %s1112_s7  ;;  %s1182_s24 = int_to_ptr.vmem [resolvable:$true] %s525_s24 }
  0x41   : > { %644 = vmatprep.subr.mxu0 %v297_v2  ;;  %723 = vmatprep.subr.mxu1 %v297_v2  ;;  %v279_v7 = vld [vmem:[#allocation6 + $0x60] sm:$0xff]  ;;  %v278_v9 = vld [vmem:[#allocation6 + $0x58] sm:$0xff]  ;;  %v293_v10 = vld [vmem:[#allocation6 + $0xd0] sm:$0xff]  ;;  %s887_s28 = scalar_lea.vmem %s1182_s24, 2048  ;;  %s979_s29 = smov [#allocation8]  }
  0x42   : > { %645 = vmatpush3.msra.mxu0 %v281_v3  ;;  %739 = vmatpush3.msra.mxu1 %v281_v3  ;;  %v277_v11 = vld [vmem:[#allocation6 + $0x50] sm:$0xff]  ;;  %v292_v12 = vld [vmem:[#allocation6 + $0xc8] sm:$0xff]  ;;  %v291_v14 = vld [vmem:[#allocation6 + $0xc0] sm:$0xff]  ;;  %p888_p1 = scmp.ne.s32.totalorder %s1182_s24, %s887_s28  ;;  %s891_s30 = sshll.u32 %s979_s29, 4  ;;  %s892_s30 = int_to_ptr.vmem [resolvable:$false] %s891_s30 }
  0x43   : > { %646 = vmatprep.subr.mxu0 %v296_v4  ;;  %724 = vmatprep.subr.mxu1 %v296_v4  ;;  %v276_v13 = vld [vmem:[#allocation6 + $0x48] sm:$0xff]  ;;  %v275_v15 = vld [vmem:[#allocation6 + $0x40] sm:$0xff]  ;;  %v290_v16 = vld [vmem:[#allocation6 + $0xb8] sm:$0xff]  ;;  %s893_s3 = scalar_lea.vmem %s892_s30, 4096  ;;  %p894_p0 = scmp.lt.s32.totalorder %s1182_s24, %s892_s30 }
  0x44   : > { %647 = vmatpush3.msra.mxu0 %v280_v5  ;;  %740 = vmatpush3.msra.mxu1 %v280_v5  ;;  %v274_v17 = vld [vmem:[#allocation6 + $0x38] sm:$0xff]  ;;  %v289_v18 = vld [vmem:[#allocation6 + $0xb0] sm:$0xff]  ;;  %v288_v20 = vld [vmem:[#allocation6 + $0xa8] sm:$0xff]  ;;  %p889_p8 = pnand %p888_p1, %p1084_p13  ;;  %p895_p2 = scmp.lt.s32.totalorder %s893_s3, %s887_s28 }
  0x45   : > { %648 = vmatprep.subr.mxu0 %v295_v6  ;;  %725 = vmatprep.subr.mxu1 %v295_v6  ;;  %v273_v19 = vld [vmem:[#allocation6 + $0x30] sm:$0xff]  ;;  %v272_v21 = vld [vmem:[#allocation6 + $0x28] sm:$0xff]  ;;  %v287_v22 = vld [vmem:[#allocation6 + $0xa0] sm:$0xff] }
  0x46   : > { %649 = vmatpush3.msra.mxu0 %v279_v7  ;;  %741 = vmatpush3.msra.mxu1 %v279_v7  ;;  %v271_v23 = vld [vmem:[#allocation6 + $0x20] sm:$0xff]  ;;  %v286_v24 = vld [vmem:[#allocation6 + $0x98] sm:$0xff]  ;;  %v285_v26 = vld [vmem:[#allocation6 + $0x90] sm:$0xff]  ;;  %p890_p10 = pneg %p889_p8  ;;  %p896_p3 = por %p895_p2, %p894_p0 }
  0x47   : > { %650 = vmatprep.subr.mxu0 %v294_v8  ;;  %726 = vmatprep.subr.mxu1 %v294_v8  ;;  %v270_v25 = vld [vmem:[#allocation6 + $0x18] sm:$0xff]  ;;  %v269_v27 = vld [vmem:[#allocation6 + $0x10] sm:$0xff]  ;;  %v284_v28 = vld [vmem:[#allocation6 + $0x88] sm:$0xff] }
  0x48   : > { %651 = vmatpush3.msra.mxu0 %v278_v9  ;;  %742 = vmatpush3.msra.mxu1 %v278_v9  ;;  %v268_v29 = vld [vmem:[#allocation6 + $0x8] sm:$0xff]  ;;  %v283_v30 = vld [vmem:[#allocation6 + $0x80] sm:$0xff]  ;;  %v237_v36 = vld [vmem:[%s1116_s23 + $0x18] sm:$0xff]  ;;  %p897_p5 = pnand %p896_p3, %p890_p10 }
  0x49   : > { %652 = vmatprep.subr.mxu0 %v293_v10  ;;  %727 = vmatprep.subr.mxu1 %v293_v10  ;;  %v267_v31 = vld [vmem:[#allocation6] sm:$0xff]  ;;  %v235_v32 = vld [vmem:[%s1116_s23 + $0x8] sm:$0xff]  ;;  %v253_v37 = vld [vmem:[%s1116_s23 + $0x98] sm:$0xff] }
  0x4a   : > { %653 = vmatpush3.msra.mxu0 %v277_v11  ;;  %743 = vmatpush3.msra.mxu1 %v277_v11  ;;  %v251_v33 = vld [vmem:[%s1116_s23 + $0x88] sm:$0xff]  ;;  %v234_v34 = vld [vmem:[%s1116_s23] sm:$0xff]  ;;  %v236_v38 = vld [vmem:[%s1116_s23 + $0x10] sm:$0xff] }
  0x4b   : > { %654 = vmatprep.subr.mxu0 %v292_v12  ;;  %728 = vmatprep.subr.mxu1 %v292_v12  ;;  %v250_v35 = vld [vmem:[%s1116_s23 + $0x80] sm:$0xff]  ;;  %v252_v39 = vld [vmem:[%s1116_s23 + $0x90] sm:$0xff]  ;;  %v239_v40 = vld [vmem:[%s1116_s23 + $0x28] sm:$0xff] }
  0x4c   : > { %655 = vmatpush3.msra.mxu0 %v276_v13  ;;  %744 = vmatpush3.msra.mxu1 %v276_v13  ;;  %v255_v41 = vld [vmem:[%s1116_s23 + $0xa8] sm:$0xff]  ;;  %v238_v42 = vld [vmem:[%s1116_s23 + $0x20] sm:$0xff]  ;;  %v241_v44 = vld [vmem:[%s1116_s23 + $0x38] sm:$0xff] }
  0x4d   : > { %656 = vmatprep.subr.mxu0 %v291_v14  ;;  %729 = vmatprep.subr.mxu1 %v291_v14  ;;  %v254_v43 = vld [vmem:[%s1116_s23 + $0xa0] sm:$0xff]  ;;  %v257_v45 = vld [vmem:[%s1116_s23 + $0xb8] sm:$0xff]  ;;  %v240_v46 = vld [vmem:[%s1116_s23 + $0x30] sm:$0xff] }
  0x4e   : > { %657 = vmatpush3.msra.mxu0 %v275_v15  ;;  %745 = vmatpush3.msra.mxu1 %v275_v15  ;;  %v256_v47 = vld [vmem:[%s1116_s23 + $0xb0] sm:$0xff]  ;;  %v243_v48 = vld [vmem:[%s1116_s23 + $0x48] sm:$0xff]  ;;  %v242_v50 = vld [vmem:[%s1116_s23 + $0x40] sm:$0xff] }
  0x4f   : > { %658 = vmatprep.subr.mxu0 %v290_v16  ;;  %730 = vmatprep.subr.mxu1 %v290_v16  ;;  %v259_v49 = vld [vmem:[%s1116_s23 + $0xc8] sm:$0xff]  ;;  %v258_v51 = vld [vmem:[%s1116_s23 + $0xc0] sm:$0xff]  ;;  %v245_v52 = vld [vmem:[%s1116_s23 + $0x58] sm:$0xff] }
  0x50   : > { %659 = vmatpush3.msra.mxu0 %v274_v17  ;;  %746 = vmatpush3.msra.mxu1 %v274_v17  ;;  %v261_v53 = vld [vmem:[%s1116_s23 + $0xd8] sm:$0xff]  ;;  %v244_v54 = vld [vmem:[%s1116_s23 + $0x50] sm:$0xff]  ;;  %v247_v56 = vld [vmem:[%s1116_s23 + $0x68] sm:$0xff] }
  0x51   : > { %660 = vmatprep.subr.mxu0 %v289_v18  ;;  %731 = vmatprep.subr.mxu1 %v289_v18  ;;  %v260_v55 = vld [vmem:[%s1116_s23 + $0xd0] sm:$0xff]  ;;  %v263_v57 = vld [vmem:[%s1116_s23 + $0xe8] sm:$0xff]  ;;  %v246_v58 = vld [vmem:[%s1116_s23 + $0x60] sm:$0xff] }
  0x52   : > { %661 = vmatpush3.msra.mxu0 %v273_v19  ;;  %747 = vmatpush3.msra.mxu1 %v273_v19  ;;  %v262_v59 = vld [vmem:[%s1116_s23 + $0xe0] sm:$0xff]  ;;  %v249_v60 = vld [vmem:[%s1116_s23 + $0x78] sm:$0xff]  ;;  %v248_v62 = vld [vmem:[%s1116_s23 + $0x70] sm:$0xff] }
  0x53   : > { %662 = vmatprep.subr.mxu0 %v288_v20  ;;  %732 = vmatprep.subr.mxu1 %v288_v20  ;;  %v265_v61 = vld [vmem:[%s1116_s23 + $0xf8] sm:$0xff]  ;;  %v264_v63 = vld [vmem:[%s1116_s23 + $0xf0] sm:$0xff] }
  0x54   : > { %663 = vmatpush3.msra.mxu0 %v272_v21  ;;  %748 = vmatpush3.msra.mxu1 %v272_v21 }
  0x55   : > { %664 = vmatprep.subr.mxu0 %v287_v22  ;;  %733 = vmatprep.subr.mxu1 %v287_v22 }
  0x56   : > { %665 = vmatpush3.msra.mxu0 %v271_v23  ;;  %749 = vmatpush3.msra.mxu1 %v271_v23 }
  0x57   : > { %666 = vmatprep.subr.mxu0 %v286_v24  ;;  %734 = vmatprep.subr.mxu1 %v286_v24 }
  0x58   : > { %667 = vmatpush3.msra.mxu0 %v270_v25  ;;  %750 = vmatpush3.msra.mxu1 %v270_v25 }
  0x59   : > { %668 = vmatprep.subr.mxu0 %v285_v26  ;;  %735 = vmatprep.subr.mxu1 %v285_v26 }
  0x5a   : > { %669 = vmatpush3.msra.mxu0 %v269_v27  ;;  %751 = vmatpush3.msra.mxu1 %v269_v27 }
  0x5b   : > { %670 = vmatprep.subr.mxu0 %v284_v28  ;;  %736 = vmatprep.subr.mxu1 %v284_v28 }
  0x5c   : > { %671 = vmatpush3.msra.mxu0 %v268_v29  ;;  %752 = vmatpush3.msra.mxu1 %v268_v29 }
  0x5d   : > { %672 = vmatprep.subr.mxu0 %v283_v30  ;;  %737 = vmatprep.subr.mxu1 %v283_v30 }
  0x5e   : > { %673 = vmatpush3.msra.mxu0 %v267_v31  ;;  %753 = vmatpush3.msra.mxu1 %v267_v31 }
  0x5f   : > { %363 = vmatprep.mubr.f32.mxu0 %v235_v32  ;;  %403 = vmatprep.mubr.f32.mxu1 %v251_v33 }
  0x60   : > { %364 = vmatmul.mubr.f32.vlgmr.msra.gmra.mxu0 %v234_v34  ;;  %404 = vmatmul.mubr.f32.vlgmr.msra.gmra.mxu1 %v250_v35 }
  0x61   : > { %368 = vmatprep.mubr.f32.mxu0 %v237_v36  ;;  %408 = vmatprep.mubr.f32.mxu1 %v253_v37 }
  0x64   : > { %369 = vmatmul.mubr.f32.gmra.mxu0 %v236_v38  ;;  %409 = vmatmul.mubr.f32.gmra.mxu1 %v252_v39 }
  0x65   : > { %373 = vmatprep.mubr.f32.mxu0 %v239_v40  ;;  %413 = vmatprep.mubr.f32.mxu1 %v255_v41 }
  0x68   : > { %374 = vmatmul.mubr.f32.gmra.mxu0 %v238_v42  ;;  %414 = vmatmul.mubr.f32.gmra.mxu1 %v254_v43 }
  0x69   : > { %378 = vmatprep.mubr.f32.mxu0 %v241_v44  ;;  %418 = vmatprep.mubr.f32.mxu1 %v257_v45 }
  0x6c   : > { %379 = vmatmul.mubr.f32.gmra.mxu0 %v240_v46  ;;  %419 = vmatmul.mubr.f32.gmra.mxu1 %v256_v47 }
  0x6d   : > { %383 = vmatprep.mubr.f32.mxu0 %v243_v48  ;;  %423 = vmatprep.mubr.f32.mxu1 %v259_v49 }
  0x70   : > { %384 = vmatmul.mubr.f32.gmra.mxu0 %v242_v50  ;;  %424 = vmatmul.mubr.f32.gmra.mxu1 %v258_v51 }
  0x71   : > { %388 = vmatprep.mubr.f32.mxu0 %v245_v52  ;;  %428 = vmatprep.mubr.f32.mxu1 %v261_v53 }
  0x74   : > { %389 = vmatmul.mubr.f32.gmra.mxu0 %v244_v54  ;;  %429 = vmatmul.mubr.f32.gmra.mxu1 %v260_v55 }
  0x75   : > { %393 = vmatprep.mubr.f32.mxu0 %v247_v56  ;;  %433 = vmatprep.mubr.f32.mxu1 %v263_v57 }
  0x78   : > { %394 = vmatmul.mubr.f32.gmra.mxu0 %v246_v58  ;;  %434 = vmatmul.mubr.f32.gmra.mxu1 %v262_v59 }
  0x79   : > { %398 = vmatprep.mubr.f32.mxu0 %v249_v60  ;;  %438 = vmatprep.mubr.f32.mxu1 %v265_v61 }
  0x7c   : > { %399 = vmatmul.mubr.f32.gmra.mxu0 %v248_v62  ;;  %439 = vmatmul.mubr.f32.gmra.mxu1 %v264_v63 }
 0x120   : > { %v674_v0 = vpop.f32.mrf.mxu0  ;;  %v698_v1 = vpop.f32.mrf.mxu1 }
 0x122   : > { %v675_v2 = vpop.f32.mrf.mxu0  ;;  %v699_v3 = vpop.f32.mrf.mxu1 }
 0x123   : > { %v676_v4 = vadd.f32 %v675_v2, %v674_v0  ;;  %v700_v5 = vadd.f32 %v699_v3, %v698_v1 }
 0x124   : > { %v677_v6 = vpop.f32.mrf.mxu0  ;;  %v701_v7 = vpop.f32.mrf.mxu1 }
 0x125   : > { %495 = vst [vmem:[%s1159_s19] sm:$0xff] %v676_v4  ;;  %503 = vst [vmem:[%s1159_s19 + $0x40] sm:$0xff] %v700_v5 }
 0x126   : > { %v678_v8 = vpop.f32.mrf.mxu0  ;;  %v702_v9 = vpop.f32.mrf.mxu1 }
 0x127   : > { %v679_v10 = vadd.f32 %v678_v8, %v677_v6  ;;  %v703_v11 = vadd.f32 %v702_v9, %v701_v7 }
 0x128   : > { %v680_v12 = vpop.f32.mrf.mxu0  ;;  %v704_v13 = vpop.f32.mrf.mxu1 }
 0x129   : > { %496 = vst [vmem:[%s1159_s19 + $0x8] sm:$0xff] %v679_v10  ;;  %504 = vst [vmem:[%s1159_s19 + $0x48] sm:$0xff] %v703_v11 }
 0x12a   : > { %v681_v14 = vpop.f32.mrf.mxu0  ;;  %v705_v15 = vpop.f32.mrf.mxu1 }
 0x12b   : > { %v682_v16 = vadd.f32 %v681_v14, %v680_v12  ;;  %v706_v17 = vadd.f32 %v705_v15, %v704_v13 }
 0x12c   : > { %v683_v18 = vpop.f32.mrf.mxu0  ;;  %v707_v19 = vpop.f32.mrf.mxu1 }
 0x12d   : > { %497 = vst [vmem:[%s1159_s19 + $0x10] sm:$0xff] %v682_v16  ;;  %505 = vst [vmem:[%s1159_s19 + $0x50] sm:$0xff] %v706_v17 }
 0x12e   : > { %v684_v20 = vpop.f32.mrf.mxu0  ;;  %v708_v21 = vpop.f32.mrf.mxu1 }
 0x12f   : > { %v685_v22 = vadd.f32 %v684_v20, %v683_v18  ;;  %v709_v23 = vadd.f32 %v708_v21, %v707_v19 }
 0x130   : > { %v686_v24 = vpop.f32.mrf.mxu0  ;;  %v710_v25 = vpop.f32.mrf.mxu1 }
 0x131   : > { %498 = vst [vmem:[%s1159_s19 + $0x18] sm:$0xff] %v685_v22  ;;  %506 = vst [vmem:[%s1159_s19 + $0x58] sm:$0xff] %v709_v23 }
 0x132   : > { %v687_v26 = vpop.f32.mrf.mxu0  ;;  %v711_v27 = vpop.f32.mrf.mxu1 }
 0x133   : > { %v688_v28 = vadd.f32 %v687_v26, %v686_v24  ;;  %v712_v29 = vadd.f32 %v711_v27, %v710_v25 }
 0x134   : > { %v689_v30 = vpop.f32.mrf.mxu0  ;;  %v713_v31 = vpop.f32.mrf.mxu1 }
 0x135   : > { %499 = vst [vmem:[%s1159_s19 + $0x20] sm:$0xff] %v688_v28  ;;  %507 = vst [vmem:[%s1159_s19 + $0x60] sm:$0xff] %v712_v29 }
 0x136   : > { %v690_v32 = vpop.f32.mrf.mxu0  ;;  %v714_v33 = vpop.f32.mrf.mxu1 }
 0x137   : > { %v691_v34 = vadd.f32 %v690_v32, %v689_v30  ;;  %v715_v35 = vadd.f32 %v714_v33, %v713_v31 }
 0x138   : > { %v692_v36 = vpop.f32.mrf.mxu0  ;;  %v716_v37 = vpop.f32.mrf.mxu1 }
 0x139   : > { %500 = vst [vmem:[%s1159_s19 + $0x28] sm:$0xff] %v691_v34  ;;  %508 = vst [vmem:[%s1159_s19 + $0x68] sm:$0xff] %v715_v35 }
 0x13a   : > { %v693_v38 = vpop.f32.mrf.mxu0  ;;  %v717_v39 = vpop.f32.mrf.mxu1 }
 0x13b   : > { %v694_v40 = vadd.f32 %v693_v38, %v692_v36  ;;  %v718_v41 = vadd.f32 %v717_v39, %v716_v37 }
 0x13c   : > { %v695_v42 = vpop.f32.mrf.mxu0  ;;  %v719_v43 = vpop.f32.mrf.mxu1 }
 0x13d   : > { %501 = vst [vmem:[%s1159_s19 + $0x30] sm:$0xff] %v694_v40  ;;  %509 = vst [vmem:[%s1159_s19 + $0x70] sm:$0xff] %v718_v41 }
 0x13e   : > { %v696_v44 = vpop.f32.mrf.mxu0  ;;  %v720_v45 = vpop.f32.mrf.mxu1 }
 0x13f   : > { %v697_v46 = vadd.f32 %v696_v44, %v695_v42  ;;  %v721_v47 = vadd.f32 %v720_v45, %v719_v43 }
 0x141   : > { %502 = vst [vmem:[%s1159_s19 + $0x38] sm:$0xff] %v697_v46  ;;  %510 = vst [vmem:[%s1159_s19 + $0x78] sm:$0xff] %v721_v47 }
 0x142   : > { %900 = shalt.err (!%p897_p5)
}
 0x143   : > { %s901_s6 = scalar_lea.hbm %s1180_s18, 2048  ;;  %s905_s16 = scalar_lea.hbm %s1234_s2, 4096 }
 0x144   : > { %p902_p7 = scmp.ne.s32.totalorder %s1180_s18, %s901_s6  ;;  %p906_p9 = scmp.lt.s32.totalorder %s1180_s18, %s1234_s2 }
 0x145   : > { %p907_p11 = scmp.lt.s32.totalorder %s905_s16, %s901_s6 }
 0x146   : > { %p903_p6 = pnand %p902_p7, %p1084_p13 }
 0x147   : > { %p908_p12 = por %p907_p11, %p906_p9 }
 0x148   : > { %p904_p4 = pneg %p903_p6 }
 0x14a   : > { %p909_p1 = pnand %p908_p12, %p904_p4 }
 0x14c   : > { %912 = shalt.err (!%p909_p1)
}
 0x14d   : > { %s980_s17 = smov 128   ;;  %s981_s19 = smov 8  }
 0x14e   : > { %760 = dma.vmem_to_hbm [thread:$0]  (%p1084_p13), %s1182_s24, 2048, %s1180_s18, %s512_s12, %s980_s17, %s980_s17, %s981_s19  }
 0x14f PF: > { %s540_s21 = sand.u32 1, %s951_s9   ;;  %p1246_p8 = scmp.ne.s32.totalorder %s1239_s20, 0 }
 0x150   : > { %p1247_p10 = scmp.ge.s32.totalorder %s971_s14, 2  ;;  %s541_s26 = scalar_lea.sflag [#allocation5], %s540_s21 }
 0x152   : > { %p771_p0 = pnand %p1247_p10, %p1246_p8 }
 0x154   : > { %p772_p2 = pneg %p771_p0 }
 0x156   : > { %946 = dma.done.wait (%p772_p2), %s541_s26, 2048  }
 0x157   : > { %948 = vsyncadd (%p772_p2), %s541_s26, 4294965248  ;;  %s19_s14 = sadd.s32 1, %s971_s14   ;;  %s1248_s9 = smov %s955_s10 }
 0x158   : > { %p16_p3 = scmp.ge.s32.totalorder %s19_s14, 4   ;;  %s1249_s10 = smov %s959_s11 }
 0x159   : > { %s1250_s11 = smov %s1093_s15  ;;  %s1251_s12 = smov %s967_s13 }
 0x15a   : > { %s1252_s13 = smov %s1254_s25  ;;  %18 = sbr.rel (!%p16_p3) target bundleno = 7 (0x7), region = 86 }
 0x15f   :  { %546 = vsyncpa [#allocation4], 1 }
 0x160   :  { %548 = vsyncpa [#allocation4 + $0x1], 1 }
 0x161   :  { %549 = vsyncpa [#allocation7], 1 }
 0x162   :  { %550 = vsyncpa [#allocation5], 1 }
 0x163   :  { %552 = vsyncpa [#allocation5 + $0x1], 1 }

</bundles_post_ra>
